<compile_context>
chip_gen: v7x
topology: tpu7x:2x2x1
jax: 0.10.0
libtpu: 0.0.40
codegen_flags: <defaults>
</compile_context>

<pallas_src>
import jax
import jax.numpy as jnp
from jax.experimental import pallas as pl
from jax.experimental.pallas import tpu as pltpu


def _round_up(x, m):
    return (x + m - 1) // m * m


# ---------------------------------------------------------------------------
# Kernel
# ---------------------------------------------------------------------------
def _attention_kernel(hx_ref, enc_ref, w1t_ref, b1_ref, w2a_ref, w2b_ref, b2_ref,
                      attw_ref, ot_ref):
    # Per-grid-step refs:
    #   hx_ref  : (bm, H)    f32
    #   enc_ref : (bm, S, H) bf16   (dominant HBM stream)
    #   w1t_ref : (H, H) f32,  b1_ref : (1, H) f32
    #   w2a_ref : (H, H) f32,  w2b_ref: (H, H) f32,  b2_ref : (1, H) f32
    #   attw_ref: (bm, S) f32
    #   ot_ref  : (bm, H) f32
    hx = hx_ref[...]
    enc = enc_ref[...].astype(jnp.float32)            # upcast once; reused twice

    # q = W1(hx): dense (bm, H) x (H, H) MXU matmul with f32 accumulation.
    q = jnp.dot(hx, w1t_ref[...], preferred_element_type=jnp.float32) + b1_ref[...]

    # scores[b, s] = <enc[b, s, :], q[b, :]> -- broadcast-multiply + lane
    # reduce (VPU/XLU) instead of bm tiny M=1 MXU matmuls.
    scores = jnp.sum(enc * q[:, None, :], axis=-1)    # (bm, S) f32

    # Softmax over the sequence axis (PyTorch Softmax(dim=1)).  Exact division
    # (att_weights is an exported output).
    m = jnp.max(scores, axis=-1, keepdims=True)
    e = jnp.exp(scores - m)
    att = e / jnp.sum(e, axis=-1, keepdims=True)      # (bm, S) f32
    attw_ref[...] = att                               # lane/sublane-dense store

    # Context vector: at[b, h] = sum_s att[b, s] * enc[b, s, h]  (VPU + sublane reduce).
    at = jnp.sum(att[:, :, None] * enc, axis=1)       # (bm, H) f32

    # vt = W2(concat([at, hx])) == at @ W2a + hx @ W2b + b2  (concat eliminated).
    vt = (jnp.dot(at, w2a_ref[...], preferred_element_type=jnp.float32)
          + jnp.dot(hx, w2b_ref[...], preferred_element_type=jnp.float32)
          + b2_ref[...])

    # ot = dropout(tanh(vt)); eval-mode dropout is the identity.
    ot_ref[...] = jnp.tanh(vt)


# ---------------------------------------------------------------------------
# Capability / sizing helpers
# ---------------------------------------------------------------------------
_BUFFERED1_OK = None


def _single_buffer_supported():
    """Probe (once) whether pl.Buffered(1) single-buffering of grid-invariant
    inputs is supported by the installed JAX / Mosaic. Falls back cleanly."""
    global _BUFFERED1_OK
    if _BUFFERED1_OK is None:
        try:
            def _probe(x_ref, o_ref):
                o_ref[...] = x_ref[...] + 1.0

            out = pl.pallas_call(
                _probe,
                out_shape=jax.ShapeDtypeStruct((8, 128), jnp.float32),
                grid=(2,),
                in_specs=[pl.BlockSpec((8, 128), lambda i: (0, 0),
                                       pipeline_mode=pl.Buffered(1))],
                out_specs=pl.BlockSpec((8, 128), lambda i: (0, 0)),
            )(jnp.zeros((8, 128), jnp.float32))
            jax.block_until_ready(out)
            _BUFFERED1_OK = True
        except Exception:
            _BUFFERED1_OK = False
    return _BUFFERED1_OK


def _vmem_budget_bytes():
    """(vmem_limit_bytes to request, byte budget used for tile sizing)."""
    try:
        cap = int(pltpu.get_tpu_info().vmem_capacity_bytes)
    except Exception:
        cap = 64 * 1024 * 1024                      # v7x-safe fallback
    limit = min(int(cap * 0.75), 112 * 1024 * 1024)  # ~96 MiB v5e/v6e, ~48 MiB v7x
    return limit, int(limit * 0.80)                  # headroom for compiler temps


def _pick_bm(B, S, H, budget):
    """Batch block size: as large as fits the VMEM budget, counting all buffers."""
    per_row = (
        2 * S * H * 2            # encoder block, bf16, double-buffered
        + 2 * S * H * 4          # f32 upcast + broadcast-product temporaries
        + 2 * H * 4              # hx block, double-buffered
        + 2 * S * 4 + 2 * S * 4  # attw output (db) + scores/att temporaries
        + 2 * H * 4 + 4 * H * 4  # ot output (db) + q/at/vt temporaries
    )
    fixed = 2 * (3 * H * H + 2 * H) * 4   # weights/biases (worst case: double-buffered)
    cap = max(8, min(256, ((budget - fixed) // per_row) // 8 * 8))
    if B <= cap:
        # One block covers the batch; split in two when it stays exact so the
        # two v7x TensorCores both get a grid step.
        if B >= 16 and B % 16 == 0 and B // 2 <= cap:
            return B // 2
        return B
    # Prefer a block size that divides B exactly (avoids a batch-padding copy).
    for bm in range(cap, 7, -8):
        if B % bm == 0:
            return bm
    return cap


# ---------------------------------------------------------------------------
# Wrapper
# ---------------------------------------------------------------------------
def prepare_attention_params(w1, b1, w2, b2):
    """Pre-transpose / split the PyTorch-layout Linear weights (cache across calls).

    w1: (H, H) (out, in), b1: (H,), w2: (H, 2H) (out, in), b2: (H,)."""
    H = w1.shape[0]
    f32 = jnp.float32
    w1t = jnp.asarray(w1, f32).T                 # y = x @ w1t
    b1r = jnp.asarray(b1, f32).reshape(1, H)
    w2t = jnp.asarray(w2, f32).T                 # (2H, H)
    w2a = w2t[:H]                                # multiplies the context `at`
    w2b = w2t[H:]                                # multiplies `hx`
    b2r = jnp.asarray(b2, f32).reshape(1, H)
    return w1t, b1r, w2a, w2b, b2r


def attention_forward(hx, encoder_states, w1t, b1r, w2a, w2b, b2r):
    """hx: (B, H), encoder_states: (B, S, H); weights from prepare_attention_params.
    Returns (att_weights (B, S) f32, ot (B, H) f32)."""
    B, H = hx.shape
    _, S, _ = encoder_states.shape
    f32 = jnp.float32

    vmem_limit, budget = _vmem_budget_bytes()
    bm = _pick_bm(B, S, H, budget)
    Bp = _round_up(B, bm)

    # Dominant stream in bf16 (halves HBM traffic); hx stays f32 (tiny stream).
    enc_in = encoder_states.astype(jnp.bfloat16)
    hx_in = hx.astype(f32)
    if Bp != B:
        enc_in = jnp.pad(enc_in, ((0, Bp - B), (0, 0), (0, 0)))
        hx_in = jnp.pad(hx_in, ((0, Bp - B), (0, 0)))

    # Grid-invariant weights: single-buffer when the runtime supports it.
    if _single_buffer_supported():
        def w_spec():
            return pl.BlockSpec((H, H), lambda i: (0, 0),
                                pipeline_mode=pl.Buffered(1))
    else:
        def w_spec():
            return pl.BlockSpec((H, H), lambda i: (0, 0))

    def b_spec():
        return pl.BlockSpec((1, H), lambda i: (0, 0))

    attw_p, ot_p = pl.pallas_call(
        _attention_kernel,
        out_shape=(
            jax.ShapeDtypeStruct((Bp, S), f32),
            jax.ShapeDtypeStruct((Bp, H), f32),
        ),
        grid_spec=pltpu.PrefetchScalarGridSpec(
            num_scalar_prefetch=0,
            grid=(Bp // bm,),
            in_specs=[
                pl.BlockSpec((bm, H), lambda i: (i, 0)),        # hx
                pl.BlockSpec((bm, S, H), lambda i: (i, 0, 0)),  # encoder_states (unpadded S/H)
                w_spec(),                                        # W1^T
                b_spec(),                                        # b1
                w_spec(),                                        # W2a
                w_spec(),                                        # W2b
                b_spec(),                                        # b2
            ],
            out_specs=[
                pl.BlockSpec((bm, S), lambda i: (i, 0)),        # att_weights (2-D, lane-dense)
                pl.BlockSpec((bm, H), lambda i: (i, 0)),        # ot
            ],
        ),
        compiler_params=pltpu.CompilerParams(
            dimension_semantics=("parallel",),
            vmem_limit_bytes=vmem_limit,
        ),
    )(hx_in, enc_in, w1t, b1r, w2a, w2b, b2r)

    return attw_p[:B], ot_p[:B]


def attention_reference(hx, encoder_states, w1, b1, w2, b2):
    """Pure-JAX reference mirroring the PyTorch forward (eval mode)."""
    q = hx @ w1.T + b1                                        # (B, H)
    scores = jnp.einsum("bsh,bh->bs", encoder_states, q)      # (B, S)
    attw = jax.nn.softmax(scores, axis=1)
    at = jnp.einsum("bs,bsh->bh", attw, encoder_states)       # (B, H)
    ut = jnp.concatenate([at, hx], axis=1)                    # (B, 2H)
    vt = ut @ w2.T + b2
    return attw, jnp.tanh(vt)


if __name__ == "__main__":
    B, S, H = 2, 8, 32
    key = jax.random.PRNGKey(0)
    k_hx, k_enc, k_w1, k_b1, k_w2, k_b2 = jax.random.split(key, 6)

    hx = jax.random.normal(k_hx, (B, H), dtype=jnp.float32)
    encoder_states = jax.random.normal(k_enc, (B, S, H), dtype=jnp.float32)

    # nn.Linear-style init: U(-1/sqrt(fan_in), 1/sqrt(fan_in))
    lim1 = 1.0 / jnp.sqrt(jnp.float32(H))
    lim2 = 1.0 / jnp.sqrt(jnp.float32(2 * H))
    w1 = jax.random.uniform(k_w1, (H, H), jnp.float32, -lim1, lim1)        # (out, in)
    b1 = jax.random.uniform(k_b1, (H,), jnp.float32, -lim1, lim1)
    w2 = jax.random.uniform(k_w2, (H, 2 * H), jnp.float32, -lim2, lim2)    # (out, in)
    b2 = jax.random.uniform(k_b2, (H,), jnp.float32, -lim2, lim2)

    params = prepare_attention_params(w1, b1, w2, b2)   # cache across calls
    fwd = jax.jit(attention_forward)
    attw, ot = fwd(hx, encoder_states, *params)
    jax.block_until_ready((attw, ot))

    attw_ref, ot_ref = attention_reference(hx, encoder_states, w1, b1, w2, b2)
    # encoder_states is streamed in bf16 (f32 accumulation) -> ~1e-2 level tolerance.
    assert attw.shape == (B, S) and ot.shape == (B, H)
    assert jnp.allclose(attw, attw_ref, atol=3e-2), "att_weights mismatch"
    assert jnp.allclose(ot, ot_ref, atol=3e-2), "ot mismatch"

    print("KERNEL_OK")
</pallas_src>

<mosaic_0001>
module attributes {stable_mosaic.version = 11 : i64} {
  func.func @_attention_kernel(%arg0: i32, %arg1: memref<2x32xf32, #tpu.memory_space<vmem>>, %arg2: memref<2x8x32xbf16, #tpu.memory_space<vmem>>, %arg3: memref<32x32xf32, #tpu.memory_space<vmem>>, %arg4: memref<1x32xf32, #tpu.memory_space<vmem>>, %arg5: memref<32x32xf32, #tpu.memory_space<vmem>>, %arg6: memref<32x32xf32, #tpu.memory_space<vmem>>, %arg7: memref<1x32xf32, #tpu.memory_space<vmem>>, %arg8: memref<2x8xf32, #tpu.memory_space<vmem>>, %arg9: memref<2x32xf32, #tpu.memory_space<vmem>>) attributes {dimension_semantics = [#tpu.dimension_semantics<parallel>], iteration_bounds = array<i64: 1>, scalar_prefetch = 0 : i64, scratch_operands = 0 : i64, tpu.core_type = #tpu.core_type<tc>, window_params = [{transform_indices = @transform_0, window_bounds = array<i64: 2, 32>}, {transform_indices = @transform_1, window_bounds = array<i64: 2, 8, 32>}, {pipeline_mode = #tpu.pipeline_mode<synchronous>, transform_indices = @transform_2, window_bounds = array<i64: 32, 32>}, {pipeline_mode = #tpu.pipeline_mode<synchronous>, transform_indices = @transform_3, window_bounds = array<i64: 1, 32>}, {pipeline_mode = #tpu.pipeline_mode<synchronous>, transform_indices = @transform_4, window_bounds = array<i64: 32, 32>}, {pipeline_mode = #tpu.pipeline_mode<synchronous>, transform_indices = @transform_5, window_bounds = array<i64: 32, 32>}, {pipeline_mode = #tpu.pipeline_mode<synchronous>, transform_indices = @transform_6, window_bounds = array<i64: 1, 32>}, {transform_indices = @transform_7, window_bounds = array<i64: 2, 8>}, {transform_indices = @transform_8, window_bounds = array<i64: 2, 32>}]} {
    %c0 = arith.constant 0 : index
    %c0_0 = arith.constant 0 : index
    %0 = vector.load %arg1[%c0, %c0_0] : memref<2x32xf32, #tpu.memory_space<vmem>>, vector<2x32xf32>
    %c0_1 = arith.constant 0 : index
    %c0_2 = arith.constant 0 : index
    %c0_3 = arith.constant 0 : index
    %1 = vector.load %arg2[%c0_1, %c0_2, %c0_3] : memref<2x8x32xbf16, #tpu.memory_space<vmem>>, vector<2x8x32xbf16>
    %2 = arith.extf %1 : vector<2x8x32xbf16> to vector<2x8x32xf32>
    %c0_4 = arith.constant 0 : index
    %c0_5 = arith.constant 0 : index
    %3 = vector.load %arg3[%c0_4, %c0_5] : memref<32x32xf32, #tpu.memory_space<vmem>>, vector<32x32xf32>
    %cst = arith.constant dense<0.000000e+00> : vector<2x32xf32>
    %4 = tpu.matmul %0, %3, %cst {dimension_numbers = #tpu.dot_dimension_numbers<[1], [0], [0], [1], [0, 0, 1, 1], [], []>} : vector<2x32xf32>, vector<32x32xf32>, vector<2x32xf32> -> vector<2x32xf32>
    %c0_6 = arith.constant 0 : index
    %c0_7 = arith.constant 0 : index
    %5 = vector.load %arg4[%c0_6, %c0_7] : memref<1x32xf32, #tpu.memory_space<vmem>>, vector<1x32xf32>
    %6 = vector.broadcast %5 : vector<1x32xf32> to vector<2x32xf32>
    %7 = arith.addf %4, %6 : vector<2x32xf32>
    %8 = vector.shape_cast %7 : vector<2x32xf32> to vector<2x1x32xf32>
    %9 = vector.broadcast %8 : vector<2x1x32xf32> to vector<2x8x32xf32>
    %10 = arith.mulf %2, %9 : vector<2x8x32xf32>
    %cst_8 = arith.constant dense<0.000000e+00> : vector<2x8xf32>
    %11 = vector.multi_reduction <add>, %10, %cst_8 [2] : vector<2x8x32xf32> to vector<2x8xf32>
    %cst_9 = arith.constant dense<0xFF800000> : vector<2xf32>
    %12 = vector.multi_reduction <maximumf>, %11, %cst_9 [1] : vector<2x8xf32> to vector<2xf32>
    %13 = vector.shape_cast %12 : vector<2xf32> to vector<2x1xf32>
    %14 = vector.broadcast %13 : vector<2x1xf32> to vector<2x8xf32>
    %15 = arith.subf %11, %14 : vector<2x8xf32>
    %16 = math.exp %15 : vector<2x8xf32>
    %cst_10 = arith.constant dense<0.000000e+00> : vector<2xf32>
    %17 = vector.multi_reduction <add>, %16, %cst_10 [1] : vector<2x8xf32> to vector<2xf32>
    %18 = vector.shape_cast %17 : vector<2xf32> to vector<2x1xf32>
    %19 = vector.broadcast %18 : vector<2x1xf32> to vector<2x8xf32>
    %20 = arith.divf %16, %19 : vector<2x8xf32>
    %c0_11 = arith.constant 0 : index
    %c0_12 = arith.constant 0 : index
    %21 = vector.load %arg8[%c0_11, %c0_12] : memref<2x8xf32, #tpu.memory_space<vmem>>, vector<2x8xf32>
    tpu.vector_store %arg8[%c0_11, %c0_12], %20 {strides = array<i32>} : memref<2x8xf32, #tpu.memory_space<vmem>>, vector<2x8xf32>,
    %22 = vector.shape_cast %20 : vector<2x8xf32> to vector<2x8x1xf32>
    %23 = vector.broadcast %22 : vector<2x8x1xf32> to vector<2x8x32xf32>
    %24 = arith.mulf %23, %2 : vector<2x8x32xf32>
    %cst_13 = arith.constant dense<0.000000e+00> : vector<2x32xf32>
    %25 = vector.multi_reduction <add>, %24, %cst_13 [1] : vector<2x8x32xf32> to vector<2x32xf32>
    %c0_14 = arith.constant 0 : index
    %c0_15 = arith.constant 0 : index
    %26 = vector.load %arg5[%c0_14, %c0_15] : memref<32x32xf32, #tpu.memory_space<vmem>>, vector<32x32xf32>
    %cst_16 = arith.constant dense<0.000000e+00> : vector<2x32xf32>
    %27 = tpu.matmul %25, %26, %cst_16 {dimension_numbers = #tpu.dot_dimension_numbers<[1], [0], [0], [1], [0, 0, 1, 1], [], []>} : vector<2x32xf32>, vector<32x32xf32>, vector<2x32xf32> -> vector<2x32xf32>
    %c0_17 = arith.constant 0 : index
    %c0_18 = arith.constant 0 : index
    %28 = vector.load %arg6[%c0_17, %c0_18] : memref<32x32xf32, #tpu.memory_space<vmem>>, vector<32x32xf32>
    %cst_19 = arith.constant dense<0.000000e+00> : vector<2x32xf32>
    %29 = tpu.matmul %0, %28, %cst_19 {dimension_numbers = #tpu.dot_dimension_numbers<[1], [0], [0], [1], [0, 0, 1, 1], [], []>} : vector<2x32xf32>, vector<32x32xf32>, vector<2x32xf32> -> vector<2x32xf32>
    %30 = arith.addf %27, %29 : vector<2x32xf32>
    %c0_20 = arith.constant 0 : index
    %c0_21 = arith.constant 0 : index
    %31 = vector.load %arg7[%c0_20, %c0_21] : memref<1x32xf32, #tpu.memory_space<vmem>>, vector<1x32xf32>
    %32 = vector.broadcast %31 : vector<1x32xf32> to vector<2x32xf32>
    %33 = arith.addf %30, %32 : vector<2x32xf32>
    %34 = math.tanh %33 : vector<2x32xf32>
    %c0_22 = arith.constant 0 : index
    %c0_23 = arith.constant 0 : index
    %35 = vector.load %arg9[%c0_22, %c0_23] : memref<2x32xf32, #tpu.memory_space<vmem>>, vector<2x32xf32>
    tpu.vector_store %arg9[%c0_22, %c0_23], %34 {strides = array<i32>} : memref<2x32xf32, #tpu.memory_space<vmem>>, vector<2x32xf32>,
    return
  }
  func.func @transform_0(%arg0: i32) -> (i32, i32) {
    %c0_i32 = arith.constant 0 : i32
    %c0_i32_0 = arith.constant 0 : i32
    return %arg0, %c0_i32 : i32, i32
  }
  func.func @transform_1(%arg0: i32) -> (i32, i32, i32) {
    %c0_i32 = arith.constant 0 : i32
    %c0_i32_0 = arith.constant 0 : i32
    %c0_i32_1 = arith.constant 0 : i32
    return %arg0, %c0_i32, %c0_i32_0 : i32, i32, i32
  }
  func.func @transform_2(%arg0: i32) -> (i32, i32) {
    %c0_i32 = arith.constant 0 : i32
    %c0_i32_0 = arith.constant 0 : i32
    %c0_i32_1 = arith.constant 0 : i32
    return %c0_i32, %c0_i32_0 : i32, i32
  }
  func.func @transform_3(%arg0: i32) -> (i32, i32) {
    %c0_i32 = arith.constant 0 : i32
    %c0_i32_0 = arith.constant 0 : i32
    %c0_i32_1 = arith.constant 0 : i32
    return %c0_i32, %c0_i32_0 : i32, i32
  }
  func.func @transform_4(%arg0: i32) -> (i32, i32) {
    %c0_i32 = arith.constant 0 : i32
    %c0_i32_0 = arith.constant 0 : i32
    %c0_i32_1 = arith.constant 0 : i32
    return %c0_i32, %c0_i32_0 : i32, i32
  }
  func.func @transform_5(%arg0: i32) -> (i32, i32) {
    %c0_i32 = arith.constant 0 : i32
    %c0_i32_0 = arith.constant 0 : i32
    %c0_i32_1 = arith.constant 0 : i32
    return %c0_i32, %c0_i32_0 : i32, i32
  }
  func.func @transform_6(%arg0: i32) -> (i32, i32) {
    %c0_i32 = arith.constant 0 : i32
    %c0_i32_0 = arith.constant 0 : i32
    %c0_i32_1 = arith.constant 0 : i32
    return %c0_i32, %c0_i32_0 : i32, i32
  }
  func.func @transform_7(%arg0: i32) -> (i32, i32) {
    %c0_i32 = arith.constant 0 : i32
    %c0_i32_0 = arith.constant 0 : i32
    return %arg0, %c0_i32 : i32, i32
  }
  func.func @transform_8(%arg0: i32) -> (i32, i32) {
    %c0_i32 = arith.constant 0 : i32
    %c0_i32_0 = arith.constant 0 : i32
    return %arg0, %c0_i32 : i32, i32
  }
}

</mosaic_0001>

<bundles_post_ra>
// kernel: attention_forward.1
= control target key start
LH: loop header
LB: loop body
LE: loop exit
PB: predicated region body
PF: predicated region fallthrough
CT: control target
= control target key end

     0   :  { %14 = vsyncpa [#allocation3], 0  ;;  %s861_s0 = inlined_call_operand.vmem [shape: f32[2,32], index: 0, kind: input, shape index: {}]   ;;  %s862_s1 = inlined_call_operand.vmem [shape: bf16[2,8,32], index: 1, kind: input, shape index: {}]   ;;  %s863_s2 = inlined_call_operand.hbm [shape: f32[32,32], index: 2, kind: input, shape index: {}]   ;;  %s864_s3 = inlined_call_operand.vmem [shape: f32[1,32], index: 3, kind: input, shape index: {}]   ;;  %s865_s4 = inlined_call_operand.vmem [shape: f32[32,32], index: 4, kind: input, shape index: {}]   ;;  %s866_s5 = inlined_call_operand.hbm [shape: f32[32,32], index: 5, kind: input, shape index: {}]   ;;  %s867_s6 = inlined_call_operand.vmem [shape: f32[1,32], index: 6, kind: input, shape index: {}]   ;;  %s868_s7 = inlined_call_operand.hbm [shape: f32[2,8], index: 7, kind: output, shape index: {0}]   ;;  %s869_s8 = inlined_call_operand.hbm [shape: f32[2,32], index: 8, kind: output, shape index: {1}]  }
   0x1   :  { %15 = vsyncpa [#allocation6], 0 }
   0x2   :  { %16 = vsyncpa [#allocation4], 0 }
   0x3   :  { %17 = vsyncpa [#allocation9], 0  ;;  %s686_s27 = smov [#allocation2]   ;;  %s590_s9 = scalar_lea.hbm %s863_s2, 512 }
   0x4   :  { %s27_s28 = sshll.u32 %s686_s27, 4  ;;  %p591_p0 = scmp.ne.s32.totalorder %s863_s2, %s590_s9  ;;  %s28_s28 = int_to_ptr.vmem [resolvable:$true] %s27_s28 }
   0x5   :  { %p594_p1 = scmp.lt.u32.totalorder %s590_s9, %s863_s2 }
   0x7   :  { %p596_p2 = pnand %p594_p1, %p591_p0 }
   0x9   :  { %599 = shalt.err (!%p596_p2)
}
   0xa   :  { %s600_s14 = scalar_lea.vmem %s28_s28, 512  ;;  %p605_p4 = scmp.lt.s32.totalorder %s28_s28, %s28_s28 }
   0xb   :  { %p601_p3 = scmp.ne.s32.totalorder %s28_s28, %s600_s14  ;;  %p606_p5 = scmp.lt.s32.totalorder %s600_s14, %s600_s14 }
   0xd   :  { %p607_p6 = por %p606_p5, %p605_p4 }
   0xf   :  { %p608_p7 = pnand %p607_p6, %p601_p3 }
  0x11   :  { %611 = shalt.err (!%p608_p7)
}
  0x12   :  { %s687_s15 = smov 128   ;;  %s688_s16 = smov 8  }
  0x13   :  { %33 = dma.hbm_to_vmem [thread:$0]  %s863_s2, 512, %s28_s28, [#allocation3], %s687_s15, %s687_s15, %s688_s16  }
  0x14   :  { %s689_s19 = smov [#allocation5]   ;;  %s612_s23 = scalar_lea.hbm %s866_s5, 512 }
  0x15   :  { %s43_s20 = sshll.u32 %s689_s19, 4  ;;  %p613_p8 = scmp.ne.s32.totalorder %s866_s5, %s612_s23  ;;  %s44_s20 = int_to_ptr.vmem [resolvable:$true] %s43_s20 }
  0x16   :  { %p616_p9 = scmp.lt.u32.totalorder %s612_s23, %s866_s5 }
  0x18   :  { %p618_p10 = pnand %p616_p9, %p613_p8 }
  0x1a   :  { %621 = shalt.err (!%p618_p10)
}
  0x1b   :  { %s622_s29 = scalar_lea.vmem %s44_s20, 512  ;;  %p627_p12 = scmp.lt.s32.totalorder %s44_s20, %s44_s20 }
  0x1c   :  { %p623_p11 = scmp.ne.s32.totalorder %s44_s20, %s622_s29  ;;  %p628_p13 = scmp.lt.s32.totalorder %s622_s29, %s622_s29 }
  0x1e   :  { %p629_p0 = por %p628_p13, %p627_p12 }
  0x20   :  { %p630_p1 = pnand %p629_p0, %p623_p11 }
  0x22   :  { %633 = shalt.err (!%p630_p1)
}
  0x23   :  { %49 = dma.hbm_to_vmem [thread:$0]  %s866_s5, 512, %s44_s20, [#allocation6], %s687_s15, %s687_s15, %s688_s16  }
  0x24   :  { %678 = dma.done.wait [#allocation3], 512  }
  0x25   :  { %679 = vsyncadd [#allocation3], 4294966784 }
  0x26   :  { %680 = dma.done.wait [#allocation6], 512  }
  0x27   :  { %681 = vsyncadd [#allocation6], 4294966784  ;;  %v690_v0 = vmov 0.0|0.0   ;;  %vm691_vm0 = vmmov 0   ;;  %v692_v1 = vmov 0.0   ;;  %v63_v2 = vld [vmem:[#allocation2] sm:$0xff]  ;;  %v152_v11 = vlaneseq }
  0x28   :  { %549 = vmatprep.subr.bf16.mxu0 %v690_v0  ;;  %524 = vmatprep.mubr.msk.f32.mxu0 %vm691_vm0, %v692_v1  ;;  %v64_v3 = vld [vmem:[#allocation2 + $0x8] sm:$0xff]  ;;  %v65_v4 = vld [vmem:[#allocation2 + $0x10] sm:$0xff]  ;;  %v66_v6 = vld [vmem:[#allocation2 + $0x18] sm:$0xff]  ;;  %vm74_vm1 = vcmask 261120   ;;  %v693_v9 = vmov 1966171168  }
  0x29   :  { %555 = vmatprep.subr.bf16.mxu1 %v690_v0  ;;  %535 = vmatprep.mubr.msk.f32.mxu1 %vm691_vm0, %v692_v1  ;;  %v550_v5 = vpack.c.bf16 %v64_v3, %v63_v2  ;;  %v553_v7 = vpack.c.bf16 %v66_v6, %v65_v4  ;;  %v774_v8 = vld [vmem:[%s861_s0] sm:$0x3]  ;;  %v150_v10 = vunpack.c.l.s4 %v693_v9  ;;  %v153_v13 = vshrl.u32 %v152_v11, 7  ;;  %v303_v3 = vld [vmem:[#allocation5 + $0x8] sm:$0xff]  ;;  %v304_v9 = vld [vmem:[#allocation5 + $0x10] sm:$0xff] }
  0x2a   :  { %v492_v14 = vld [vmem:[%s864_s3] ss:$0 sm:$0xff]  ;;  %v192_v33 = vand.u32 127, %v152_v11  ;;  %vm201_vm2 = vcmask 1041409   ;;  %vm204_vm3 = vcmask 58368   ;;  %v694_v41 = vmov 0  }
  0x2b   :  { %551 = vmatpush3.bf16.msra.mxu0 %v550_v5  ;;  %v151_v12 = vunpack.c.0.s8 %v150_v10  ;;  %v786_v19 = vld [vmem:[%s862_s1] sm:$0xff]   ;;  %v173_v21 = vsub.s32 0, %v153_v13  ;;  %579 = vset.pattern.permute.xlu0 %v694_v41  ;;  %v215_v42 = vsub.s32 1, %v153_v13  ;;  %v299_v6 = vld [vmem:[%s865_s4 + $0x8] sm:$0xff]  ;;  %v305_v10 = vld [vmem:[#allocation5 + $0x18] sm:$0xff] }
  0x2c   :  { %552 = vmatprep.subr.bf16.mxu0 %v690_v0  ;;  %v499_v24 = vunpack.c.l.bf16 %v786_v19  ;;  %v500_v26 = vunpack.c.h.bf16 %v786_v19  ;;  %v796_v35 = vsub.s32 %v192_v33, %v153_v13  ;;  %578 = vset.pattern.permute.xlu1 %v694_v41  ;;  %v302_v2 = vld [vmem:[#allocation5] sm:$0xff]  ;;  %v559_v11 = vpack.c.bf16 %v305_v10, %v304_v9 }
  0x2d   :  { %v154_v15 = vsub.s32 %v151_v12, %v153_v13  ;;  %v556_v4 = vpack.c.bf16 %v303_v3, %v302_v2  ;;  %v298_v5 = vld [vmem:[%s865_s4] sm:$0xff]  ;;  %v300_v12 = vld [vmem:[%s865_s4 + $0x10] sm:$0xff]  ;;  %v301_v13 = vld [vmem:[%s865_s4 + $0x18] sm:$0xff]  ;;  %s695_s4 = smov [#allocation7]  }
  0x2e   :  { %s468_s18 = sshll.u32 %s695_s4, 4  ;;  %s469_s18 = int_to_ptr.vmem [resolvable:$true] %s468_s18 }
  0x2f   :  { %554 = vmatpush3.bf16.msra.mxu0 %v553_v7  ;;  %v562_v7 = vpack.c.bf16 %v299_v6, %v298_v5  ;;  %557 = vmatpush3.bf16.msra.mxu1 %v556_v4  ;;  %s634_s19 = scalar_lea.vmem %s469_s18, 32  ;;  %p639_p3 = scmp.lt.s32.totalorder %s469_s18, %s469_s18 }
  0x30   :  { %561 = vmatprep.subr.bf16.mxu0 %v690_v0  ;;  %558 = vmatprep.subr.bf16.mxu1 %v690_v0  ;;  %p635_p2 = scmp.ne.s32.totalorder %s469_s18, %s634_s19  ;;  %p640_p4 = scmp.lt.s32.totalorder %s634_s19, %s634_s19 }
  0x32   :  { %525 = vmatmul.mubr.msk.f32.vlgmr.msra.gmra.mrb[0].mxu0 %vm74_vm1, %v774_v8  ;;  %p641_p5 = por %p640_p4, %p639_p3 }
  0x33   :  { %546 = vmatprep.mubr.msk.f32.mxu0 %vm691_vm0, %v692_v1  ;;  %563 = vmatpush3.bf16.msra.mxu0 %v562_v7 }
  0x34   :  { %564 = vmatprep.subr.bf16.mxu0 %v690_v0  ;;  %560 = vmatpush3.bf16.msra.mxu1 %v559_v11  ;;  %p642_p6 = pnand %p641_p5, %p635_p2 }
  0x37   :  { %536 = vmatmul.mubr.msk.f32.vlgmr.msra.gmra.mrb[0].mxu1 %vm74_vm1, %v774_v8 }
 0x105   :  { %v144_v16 = vpop.f32.mrb[0].mxu0 }
 0x106   :  { %v145_v17 = vadd.f32 %v492_v14, %v144_v16  ;;  %v526_v18 = vpop.f32.mrb[1].mxu0  ;;  %v565_v14 = vpack.c.bf16 %v301_v13, %v300_v12 }
 0x108   :  { %v155_v20 = vrot.slane %v145_v17, %v154_v15  ;;  %566 = vmatpush3.bf16.msra.mxu0 %v565_v14 }
 0x10a   :  { %v156_v22 = vcombine.high %v155_v20, %v155_v20  ;;  %v163_v23 = vrot.slane %v155_v20, %v154_v15 }
 0x10c   :  { %v174_v25 = vrot.slane %v163_v23, %v173_v21  ;;  %v170_v27 = vrot.slane %v156_v22, %v154_v15 }
 0x10e   :  { %v181_v28 = vmul.f32 %v499_v24, %v174_v25  ;;  %v178_v29 = vrot.slane %v170_v27, %v173_v21 }
 0x110   :  { %v183_v30 = vsel %vm74_vm1, %v181_v28, 0.0  ;;  %v182_v31 = vmul.f32 %v500_v26, %v178_v29 }
 0x111   :  { %184 = vadd.xlane.f32.xlu0 %v183_v30 }
 0x112   :  { %v186_v32 = vsel %vm74_vm1, %v182_v31, 0.0 }
 0x115   :  { %187 = vadd.xlane.f32.xlu0 %v186_v32 }
 0x19e   :  { %v185_v34 = vpop.xlane.xlu0 %184 }
 0x19f   :  { %v196_v37 = vrot.slane %v185_v34, %v796_v35 }
 0x1a2   :  { %v188_v36 = vpop.xlane.xlu0 %187 }
 0x1a3   :  { %v200_v38 = vrot.slane %v188_v36, %v796_v35 }
 0x1a5   :  { %v202_v39 = vsel %vm201_vm2, %v200_v38, %v196_v37 }
 0x1a6   :  { %v205_v40 = vsel %vm204_vm3, %v202_v39, -inf }
 0x1a7   :  { %206 = vmax.xlane.f32.xlu1 %v205_v40 }
 0x234   :  { %v207_v43 = vpop.xlane.xlu1 %206 }
 0x235   :  { %v212_v44 = vrot.slane %v207_v43, %v173_v21  ;;  %v216_v45 = vrot.slane %v207_v43, %v215_v42 }
 0x237   :  { %v219_v46 = vsub.f32 %v185_v34, %v212_v44  ;;  %v220_v47 = vsub.f32 %v188_v36, %v216_v45 }
 0x239   :  { %v221_v48 = vmul.f32 1.442695, %v219_v46  ;;  %v223_v49 = vmul.f32 1.442695, %v220_v47 }
 0x23b   :  { %580 = vpow2.f32 %v221_v48 }
 0x23c   :  { %582 = vpow2.f32 %v223_v49 }
 0x245   :  { %v581_v50 = vpop.eup %580 }
 0x246   :  { %v583_v51 = vpop.eup %582  ;;  %228 = vperm.xlu1 %578, %v581_v50  }
 0x247   :  { %231 = vperm.xlu0 %579, %v583_v51  }
 0x2c5   :  { %v229_v52 = vpop.permute.xlu1 %228 }
 0x2c6   :  { %v232_v53 = vpop.permute.xlu0 %231  ;;  %v236_v54 = vrot.slane %v229_v52, %v796_v35 }
 0x2c7   :  { %v240_v55 = vrot.slane %v232_v53, %v796_v35 }
 0x2c9   :  { %v241_v56 = vsel %vm201_vm2, %v240_v55, %v236_v54 }
 0x2ca   :  { %v243_v57 = vsel %vm204_vm3, %v241_v56, 0.0 }
 0x2cb   :  { %244 = vadd.xlane.f32.xlu1 %v243_v57 }
 0x358   :  { %v245_v58 = vpop.xlane.xlu1 %244 }
 0x359   :  { %v250_v59 = vrot.slane %v245_v58, %v173_v21  ;;  %v254_v60 = vrot.slane %v245_v58, %v215_v42 }
 0x35b   :  { %584 = vrcp.f32 %v250_v59 }
 0x35c   :  { %586 = vrcp.f32 %v254_v60 }
 0x365   :  { %v585_v61 = vpop.eup %584 }
 0x366   :  { %v258_v62 = vmul.f32 %v585_v61, %v581_v50  ;;  %v587_v63 = vpop.eup %586 }
 0x367   :  { %v260_v1 = vmul.f32 %v587_v63, %v583_v51 }
 0x368   :  { %264 = vperm.xlu0 %579, %v258_v62  }
 0x36c   :  { %267 = vperm.xlu0 %579, %v260_v1  }
 0x3e7   :  { %v265_v15 = vpop.permute.xlu0 %264 }
 0x3e8   :  { %v282_v16 = vmul.f32 %v499_v24, %v265_v15  ;;  %v272_v20 = vrot.slane %v265_v15, %v796_v35 }
 0x3ea   :  { %v284_v0 = vsel %vm74_vm1, %v282_v16, 0.0 }
 0x3eb   :  { %v285_v17 = vrot.slane %v284_v0, 4  ;;  %v268_v18 = vpop.permute.xlu0 %267 }
 0x3ec   :  { %v276_v21 = vrot.slane %v268_v18, %v796_v35  ;;  %v283_v22 = vmul.f32 %v500_v26, %v268_v18  ;;  %v372_v26 = vpop.f32.mrb[0].mxu1 }
 0x3ed   :  { %v286_v23 = vadd.f32 %v285_v17, %v284_v0  ;;  %v537_v36 = vpop.f32.mrb[1].mxu1 }
 0x3ee   :  { %v291_v25 = vsel %vm74_vm1, %v283_v22, 0.0  ;;  %v277_v8 = vsel %vm201_vm2, %v276_v21, %v272_v20 }
 0x3ef   :  { %v287_v27 = vrot.slane %v286_v23, 2  ;;  %v292_v28 = vrot.slane %v291_v25, 4  ;;  %279 = vst.msk [vmem:[#allocation7] sm:$0x3] %vm204_vm3, %v277_v8 }
 0x3f1   :  { %v288_v24 = vadd.f32 %v287_v27, %v286_v23  ;;  %v293_v29 = vadd.f32 %v292_v28, %v291_v25 }
 0x3f3   :  { %v294_v30 = vrot.slane %v293_v29, 2  ;;  %v289_v31 = vrot.slane %v288_v24, 1 }
 0x3f5   :  { %v295_v32 = vadd.f32 %v294_v30, %v293_v29  ;;  %v290_v34 = vadd.f32 %v289_v31, %v288_v24 }
 0x3f7   :  { %v296_v33 = vrot.slane %v295_v32, 1 }
 0x3f9   :  { %v297_v35 = vadd.f32 %v296_v33, %v295_v32 }
 0x3fb   :  { %v378_v19 = vsel %vm201_vm2, %v297_v35, %v290_v34 }
 0x3fc   :  { %547 = vmatmul.mubr.msk.f32.vlgmr.msra.gmra.mrb[2].mxu0 %vm74_vm1, %v378_v19 }
 0x3fd   :  { %645 = shalt.err (!%p642_p6)
}
 0x3fe   :  { %s646_s22 = scalar_lea.hbm %s868_s7, 32 }
 0x3ff   :  { %p647_p7 = scmp.ne.s32.totalorder %s868_s7, %s646_s22  ;;  %p650_p8 = scmp.lt.u32.totalorder %s646_s22, %s868_s7 }
 0x401   :  { %p652_p9 = pnand %p650_p8, %p647_p7 }
 0x403   :  { %655 = shalt.err (!%p652_p9)
}
 0x404   :  { %471 = dma.vmem_to_hbm [thread:$0]  %s469_s18, 32, %s868_s7, [#allocation4]   ;;  %v496_v38 = vld [vmem:[%s867_s6] ss:$0 sm:$0xff]  ;;  %vm460_vm4 = vcmask 254976  }
 0x405   :  { %s696_s5 = smov [#allocation8]  }
 0x406   :  { %s478_s30 = sshll.u32 %s696_s5, 4  ;;  %s479_s30 = int_to_ptr.vmem [resolvable:$true] %s478_s30 }
 0x407   :  { %s656_s9 = scalar_lea.vmem %s479_s30, 32  ;;  %p661_p11 = scmp.lt.s32.totalorder %s479_s30, %s479_s30 }
 0x408   :  { %p657_p10 = scmp.ne.s32.totalorder %s479_s30, %s656_s9  ;;  %p662_p12 = scmp.lt.s32.totalorder %s656_s9, %s656_s9 }
 0x40a   :  { %p663_p13 = por %p662_p12, %p661_p11 }
 0x40c   :  { %p664_p0 = pnand %p663_p13, %p657_p10 }
 0x4cf   :  { %v447_v37 = vpop.f32.mrb[2].mxu0 }
 0x4d0   :  { %v448_v39 = vadd.f32 %v447_v37, %v372_v26  ;;  %v548_v40 = vpop.f32.mrb[3].mxu0 }
 0x4d2   :  { %v458_v41 = vadd.f32 %v496_v38, %v448_v39 }
 0x4d4   :  { %588 = vtanh.f32 %v458_v41 }
 0x4de   :  { %v589_v42 = vpop.eup %588 }
 0x4df   :  { %461 = vst.msk [vmem:[#allocation8] sm:$0x3] %vm460_vm4, %v589_v42 }
 0x4e0   :  { %667 = shalt.err (!%p664_p0)
}
 0x4e1   :  { %s668_s6 = scalar_lea.hbm %s869_s8, 32 }
 0x4e2   :  { %p669_p1 = scmp.ne.s32.totalorder %s869_s8, %s668_s6  ;;  %p672_p2 = scmp.lt.u32.totalorder %s668_s6, %s869_s8 }
 0x4e4   :  { %p674_p3 = pnand %p672_p2, %p669_p1 }
 0x4e6   :  { %677 = shalt.err (!%p674_p3)
}
 0x4e7   :  { %481 = dma.vmem_to_hbm [thread:$0]  %s479_s30, 32, %s869_s8, [#allocation9]  }
 0x4e8   :  { %682 = dma.done.wait [#allocation4], 32  }
 0x4e9   :  { %683 = vsyncadd [#allocation4], 4294967264 }
 0x4ea   :  { %684 = dma.done.wait [#allocation9], 32  }
 0x4eb   :  { %685 = vsyncadd [#allocation9], 4294967264 }
 0x4ec   :  { %488 = vsyncpa [#allocation3], 1 }
 0x4ed   :  { %489 = vsyncpa [#allocation6], 1 }
 0x4ee   :  { %490 = vsyncpa [#allocation4], 1 }
 0x4ef   :  { %491 = vsyncpa [#allocation9], 1 }

</bundles_post_ra>
